<compile_context>
chip_gen: v5e
topology: v5e:2x2
jax: 0.10.0
libtpu: 0.0.40
codegen_flags: <defaults>
</compile_context>

<pallas_src>
import jax
import jax.numpy as jnp
from jax.experimental import pallas as pl
from jax.experimental.pallas import tpu as pltpu


def transition_kernel(x_ref, scale_ref, bias_ref, w_ref, o_ref):
    # x_ref:     (TR, 4*Cp)  window-major rows: the 4 pixels of each 2x2 pooling
    #                        window have their channels concatenated on the lane
    #                        dim (slice i = pixel dh*2+dw).  f32 or bf16.
    # scale_ref: (1, Cp)     folded BN scale (gamma / sqrt(var+eps)), f32
    # bias_ref:  (1, Cp)     folded BN bias  (beta - mean*scale),     f32
    # w_ref:     (Cp, Cop)   1x1 conv weight (Cin-major), f32 or bf16
    # o_ref:     (TR, Cop)
    c = w_ref.shape[0]                      # Cp (static)
    s = scale_ref[...]                      # (1, Cp)
    b = bias_ref[...]                       # (1, Cp)
    # BN + ReLU per window pixel, accumulated in place (f32).  Only one
    # (TR, Cp) f32 temporary stays live (4x less vreg/VMEM pressure than
    # materializing the full (TR, 4*Cp) normalized tile).
    acc = jnp.maximum(x_ref[:, 0 * c:1 * c].astype(jnp.float32) * s + b, 0.0)
    acc = acc + jnp.maximum(x_ref[:, 1 * c:2 * c].astype(jnp.float32) * s + b, 0.0)
    acc = acc + jnp.maximum(x_ref[:, 2 * c:3 * c].astype(jnp.float32) * s + b, 0.0)
    acc = acc + jnp.maximum(x_ref[:, 3 * c:4 * c].astype(jnp.float32) * s + b, 0.0)
    pooled = 0.25 * acc                                           # 2x2 avg pool
    # 1x1 conv on the pooled activations (MXU), f32 accumulation.
    y = jnp.dot(pooled.astype(w_ref.dtype), w_ref[...],
                preferred_element_type=jnp.float32)               # (TR, Cop)
    o_ref[...] = y.astype(o_ref.dtype)


def _round_up(x, m):
    return ((x + m - 1) // m) * m


def _vmem_capacity_bytes():
    """Generation-aware VMEM capacity (128 MiB v5e/v6e, 64 MiB v7x)."""
    try:
        info = pltpu.get_tpu_info()
        cap = getattr(info, "vmem_capacity_bytes", None)
        if cap:
            return int(cap)
    except Exception:
        pass
    return 64 * 1024 * 1024   # conservative fallback (v7x-sized)


def transition_forward(x_nchw, gamma, beta, running_mean, running_var, conv_w,
                       eps=1e-5, compute_dtype=jnp.float32, out_dtype=None):
    """DenseNet Transition: BN(eval) -> ReLU -> Conv2d(1x1, no bias) -> AvgPool2d(2,2).

    NCHW in / NCHW out (matches the PyTorch module).
    compute_dtype: dtype of the activation/weight HBM traffic and the MXU matmul
      inputs.  f32 (default) matches PyTorch numerics tightly; jnp.bfloat16 is
      the explicit perf opt-in (~2x less HBM traffic; BN/ReLU/pool and the
      matmul accumulation still run in f32).
    out_dtype: dtype of the returned tensor (defaults to x's dtype).
    """
    N, Cin, H, W = x_nchw.shape
    Cout = conv_w.shape[0]
    if out_dtype is None:
        out_dtype = x_nchw.dtype
    Ho, Wo = H // 2, W // 2                     # AvgPool2d(2,2) floor behavior
    x_nchw = x_nchw[:, :, :2 * Ho, :2 * Wo]     # drop trailing odd row/col
    P = Ho * Wo
    R = N * P                                   # flattened (batch, pooled-pixel) rows

    Cp = _round_up(Cin, 128)                    # lane-aligned input channels
    Cop = _round_up(Cout, 128)                  # lane-dense output channels

    # --- fold BatchNorm (eval mode) into per-channel scale/bias --------------
    inv_std = 1.0 / jnp.sqrt(running_var.astype(jnp.float32) + eps)
    scale_c = gamma.astype(jnp.float32) * inv_std
    bias_c = beta.astype(jnp.float32) - running_mean.astype(jnp.float32) * scale_c
    # padded channels get scale = bias = 0  =>  relu(0) = 0  =>  no effect
    scale_c = jnp.pad(scale_c, (0, Cp - Cin)).reshape(1, Cp)
    bias_c = jnp.pad(bias_c, (0, Cp - Cin)).reshape(1, Cp)

    # --- 1x1 conv weight: (Cout, Cin, 1, 1) -> (Cp, Cop), zero padded --------
    w = conv_w.reshape(Cout, Cin).T.astype(jnp.float32)
    w = jnp.pad(w, ((0, Cp - Cin), (0, Cop - Cout))).astype(compute_dtype)

    # --- NCHW -> window-major (R, 4*Cp); the compute_dtype cast is fused into
    #     the same pad/reshape/transpose so the HBM intermediate (and the
    #     kernel's dominant read) is already narrow when compute_dtype=bf16 ----
    # element (n*P + ho*Wo + wo, (dh*2+dw)*Cp + c) == x[n, c, 2*ho+dh, 2*wo+dw]
    xp = jnp.pad(x_nchw.astype(compute_dtype),
                 ((0, 0), (0, Cp - Cin), (0, 0), (0, 0)))
    x4 = (xp.reshape(N, Cp, Ho, 2, Wo, 2)
            .transpose(0, 2, 4, 3, 5, 1)
            .reshape(R, 4 * Cp))

    # --- generation-aware row tile: x block targets ~1/16 of physical VMEM ---
    vmem_cap = _vmem_capacity_bytes()
    x_itemsize = jnp.dtype(compute_dtype).itemsize
    row_bytes = 4 * Cp * x_itemsize
    target_x_bytes = max(512 * 1024, vmem_cap // 16)      # 8 MiB v5e/v6e, 4 MiB v7x
    TR = (target_x_bytes // row_bytes) // 8 * 8
    TR = int(max(8, min(1024, TR)))
    if R < TR:
        TR = _round_up(R, 8)
    Rp = _round_up(R, TR)           # pad rows to a tile multiple (never a giant
    if Rp > R:                      # fallback block); padded rows are sliced off
        x4 = jnp.pad(x4, ((0, Rp - R), (0, 0)))
    grid = (Rp // TR,)

    # --- explicit scoped-VMEM budget: double-buffered blocks + f32 temps -----
    out_itemsize = jnp.dtype(out_dtype).itemsize
    x_blk = TR * 4 * Cp * x_itemsize
    out_blk = TR * Cop * out_itemsize
    const_blk = 2 * Cp * 4 + Cp * Cop * jnp.dtype(compute_dtype).itemsize
    temps = 3 * TR * Cp * 4 + TR * Cop * 4
    vmem_limit = int(min(vmem_cap,
                         max(2 * (x_blk + out_blk + const_blk) + temps + (2 << 20),
                             16 << 20)))

    out = pl.pallas_call(
        transition_kernel,
        out_shape=jax.ShapeDtypeStruct((Rp, Cop), out_dtype),
        grid_spec=pltpu.PrefetchScalarGridSpec(
            num_scalar_prefetch=0,
            grid=grid,
            in_specs=[
                pl.BlockSpec((TR, 4 * Cp), lambda r: (r, 0)),
                # constant-index blocks: DMA'd once (block index never changes)
                pl.BlockSpec((1, Cp), lambda r: (0, 0)),
                pl.BlockSpec((1, Cp), lambda r: (0, 0)),
                pl.BlockSpec((Cp, Cop), lambda r: (0, 0)),
            ],
            out_specs=pl.BlockSpec((TR, Cop), lambda r: (r, 0)),
        ),
        compiler_params=pltpu.CompilerParams(
            dimension_semantics=("parallel",),
            vmem_limit_bytes=vmem_limit),
    )(x4, scale_c, bias_c, w)

    # (Rp, Cop) -> NCHW (N, Cout, Ho, Wo)
    out = out[:R, :Cout].reshape(N, Ho, Wo, Cout)
    return jnp.transpose(out, (0, 3, 1, 2))


def transition_reference(x, gamma, beta, rm, rv, conv_w, eps=1e-5):
    """Pure-JAX reference (eval-mode BN), NCHW in/out."""
    N, Cin, H, W = x.shape
    Cout = conv_w.shape[0]
    xn = (x - rm[None, :, None, None]) / jnp.sqrt(rv[None, :, None, None] + eps)
    xn = xn * gamma[None, :, None, None] + beta[None, :, None, None]
    xn = jnp.maximum(xn, 0.0)
    y = jnp.einsum('nchw,oc->nohw', xn, conv_w.reshape(Cout, Cin))
    y = y.reshape(N, Cout, H // 2, 2, W // 2, 2).mean(axis=(3, 5))
    return y


if __name__ == "__main__":
    key = jax.random.PRNGKey(0)
    k_x, k_g, k_b, k_m, k_v, k_w = jax.random.split(key, 6)

    in_channels, out_channels = 4, 2
    N, H, W = 2, 16, 16

    x = jax.random.normal(k_x, (N, in_channels, H, W), dtype=jnp.float32)
    gamma = jax.random.uniform(k_g, (in_channels,), jnp.float32, 0.5, 1.5)
    beta = 0.1 * jax.random.normal(k_b, (in_channels,), jnp.float32)
    running_mean = 0.1 * jax.random.normal(k_m, (in_channels,), jnp.float32)
    running_var = jax.random.uniform(k_v, (in_channels,), jnp.float32, 0.5, 1.5)
    conv_w = jax.random.normal(k_w, (out_channels, in_channels, 1, 1),
                               jnp.float32) / jnp.sqrt(in_channels)

    ref = transition_reference(x, gamma, beta, running_mean, running_var, conv_w)

    # Exact path (default): f32 traffic/matmul — tight parity with PyTorch f32.
    out_f32 = transition_forward(x, gamma, beta, running_mean, running_var, conv_w)
    out_f32 = jax.block_until_ready(out_f32)
    assert out_f32.shape == (N, out_channels, H // 2, W // 2), out_f32.shape
    assert jnp.allclose(out_f32, ref, atol=1e-5, rtol=1e-5), (
        float(jnp.max(jnp.abs(out_f32 - ref))))

    # Perf path (explicit opt-in): bf16 activation/weight/output traffic,
    # f32 BN/ReLU/pool math and f32 matmul accumulation inside the kernel.
    out_bf16 = transition_forward(x, gamma, beta, running_mean, running_var,
                                  conv_w, compute_dtype=jnp.bfloat16,
                                  out_dtype=jnp.bfloat16)
    out_bf16 = jax.block_until_ready(out_bf16)
    assert out_bf16.shape == (N, out_channels, H // 2, W // 2), out_bf16.shape
    assert out_bf16.dtype == jnp.bfloat16
    assert jnp.allclose(out_bf16.astype(jnp.float32), ref,
                        atol=7.5e-2, rtol=5e-2), (
        float(jnp.max(jnp.abs(out_bf16.astype(jnp.float32) - ref))))

    print("KERNEL_OK")
</pallas_src>

<mosaic_0001>
module attributes {stable_mosaic.version = 11 : i64} {
  func.func @transition_kernel(%arg0: i32, %arg1: memref<128x512xf32, #tpu.memory_space<vmem>>, %arg2: memref<1x128xf32, #tpu.memory_space<vmem>>, %arg3: memref<1x128xf32, #tpu.memory_space<vmem>>, %arg4: memref<128x128xf32, #tpu.memory_space<vmem>>, %arg5: memref<128x128xf32, #tpu.memory_space<vmem>>) attributes {dimension_semantics = [#tpu.dimension_semantics<parallel>], iteration_bounds = array<i64: 1>, scalar_prefetch = 0 : i64, scratch_operands = 0 : i64, tpu.core_type = #tpu.core_type<tc>, window_params = [{transform_indices = @transform_0, window_bounds = array<i64: 128, 512>}, {pipeline_mode = #tpu.pipeline_mode<synchronous>, transform_indices = @transform_1, window_bounds = array<i64: 1, 128>}, {pipeline_mode = #tpu.pipeline_mode<synchronous>, transform_indices = @transform_2, window_bounds = array<i64: 1, 128>}, {pipeline_mode = #tpu.pipeline_mode<synchronous>, transform_indices = @transform_3, window_bounds = array<i64: 128, 128>}, {transform_indices = @transform_4, window_bounds = array<i64: 128, 128>}]} {
    %c0 = arith.constant 0 : index
    %c0_0 = arith.constant 0 : index
    %0 = vector.load %arg2[%c0, %c0_0] : memref<1x128xf32, #tpu.memory_space<vmem>>, vector<1x128xf32>
    %c0_1 = arith.constant 0 : index
    %c0_2 = arith.constant 0 : index
    %1 = vector.load %arg3[%c0_1, %c0_2] : memref<1x128xf32, #tpu.memory_space<vmem>>, vector<1x128xf32>
    %c0_3 = arith.constant 0 : index
    %c0_4 = arith.constant 0 : index
    %2 = vector.load %arg1[%c0_3, %c0_4] : memref<128x512xf32, #tpu.memory_space<vmem>>, vector<128x128xf32>
    %3 = vector.broadcast %0 : vector<1x128xf32> to vector<128x128xf32>
    %4 = arith.mulf %2, %3 : vector<128x128xf32>
    %5 = vector.broadcast %1 : vector<1x128xf32> to vector<128x128xf32>
    %6 = arith.addf %4, %5 : vector<128x128xf32>
    %cst = arith.constant 0.000000e+00 : f32
    %7 = vector.broadcast %cst : f32 to vector<128x128xf32>
    %8 = arith.maximumf %6, %7 : vector<128x128xf32>
    %c0_5 = arith.constant 0 : index
    %c128 = arith.constant 128 : index
    %9 = vector.load %arg1[%c0_5, %c128] : memref<128x512xf32, #tpu.memory_space<vmem>>, vector<128x128xf32>
    %10 = vector.broadcast %0 : vector<1x128xf32> to vector<128x128xf32>
    %11 = arith.mulf %9, %10 : vector<128x128xf32>
    %12 = vector.broadcast %1 : vector<1x128xf32> to vector<128x128xf32>
    %13 = arith.addf %11, %12 : vector<128x128xf32>
    %cst_6 = arith.constant 0.000000e+00 : f32
    %14 = vector.broadcast %cst_6 : f32 to vector<128x128xf32>
    %15 = arith.maximumf %13, %14 : vector<128x128xf32>
    %16 = arith.addf %8, %15 : vector<128x128xf32>
    %c0_7 = arith.constant 0 : index
    %c256 = arith.constant 256 : index
    %17 = vector.load %arg1[%c0_7, %c256] : memref<128x512xf32, #tpu.memory_space<vmem>>, vector<128x128xf32>
    %18 = vector.broadcast %0 : vector<1x128xf32> to vector<128x128xf32>
    %19 = arith.mulf %17, %18 : vector<128x128xf32>
    %20 = vector.broadcast %1 : vector<1x128xf32> to vector<128x128xf32>
    %21 = arith.addf %19, %20 : vector<128x128xf32>
    %cst_8 = arith.constant 0.000000e+00 : f32
    %22 = vector.broadcast %cst_8 : f32 to vector<128x128xf32>
    %23 = arith.maximumf %21, %22 : vector<128x128xf32>
    %24 = arith.addf %16, %23 : vector<128x128xf32>
    %c0_9 = arith.constant 0 : index
    %c384 = arith.constant 384 : index
    %25 = vector.load %arg1[%c0_9, %c384] : memref<128x512xf32, #tpu.memory_space<vmem>>, vector<128x128xf32>
    %26 = vector.broadcast %0 : vector<1x128xf32> to vector<128x128xf32>
    %27 = arith.mulf %25, %26 : vector<128x128xf32>
    %28 = vector.broadcast %1 : vector<1x128xf32> to vector<128x128xf32>
    %29 = arith.addf %27, %28 : vector<128x128xf32>
    %cst_10 = arith.constant 0.000000e+00 : f32
    %30 = vector.broadcast %cst_10 : f32 to vector<128x128xf32>
    %31 = arith.maximumf %29, %30 : vector<128x128xf32>
    %32 = arith.addf %24, %31 : vector<128x128xf32>
    %cst_11 = arith.constant 2.500000e-01 : f32
    %33 = vector.broadcast %cst_11 : f32 to vector<128x128xf32>
    %34 = arith.mulf %33, %32 : vector<128x128xf32>
    %c0_12 = arith.constant 0 : index
    %c0_13 = arith.constant 0 : index
    %35 = vector.load %arg4[%c0_12, %c0_13] : memref<128x128xf32, #tpu.memory_space<vmem>>, vector<128x128xf32>
    %cst_14 = arith.constant dense<0.000000e+00> : vector<128x128xf32>
    %36 = tpu.matmul %34, %35, %cst_14 {dimension_numbers = #tpu.dot_dimension_numbers<[1], [0], [0], [1], [0, 0, 1, 1], [], []>} : vector<128x128xf32>, vector<128x128xf32>, vector<128x128xf32> -> vector<128x128xf32>
    %c0_15 = arith.constant 0 : index
    %c0_16 = arith.constant 0 : index
    %37 = vector.load %arg5[%c0_15, %c0_16] : memref<128x128xf32, #tpu.memory_space<vmem>>, vector<128x128xf32>
    tpu.vector_store %arg5[%c0_15, %c0_16], %36 {strides = array<i32>} : memref<128x128xf32, #tpu.memory_space<vmem>>, vector<128x128xf32>,
    return
  }
  func.func @transform_0(%arg0: i32) -> (i32, i32) {
    %c0_i32 = arith.constant 0 : i32
    %c0_i32_0 = arith.constant 0 : i32
    return %arg0, %c0_i32 : i32, i32
  }
  func.func @transform_1(%arg0: i32) -> (i32, i32) {
    %c0_i32 = arith.constant 0 : i32
    %c0_i32_0 = arith.constant 0 : i32
    %c0_i32_1 = arith.constant 0 : i32
    return %c0_i32, %c0_i32_0 : i32, i32
  }
  func.func @transform_2(%arg0: i32) -> (i32, i32) {
    %c0_i32 = arith.constant 0 : i32
    %c0_i32_0 = arith.constant 0 : i32
    %c0_i32_1 = arith.constant 0 : i32
    return %c0_i32, %c0_i32_0 : i32, i32
  }
  func.func @transform_3(%arg0: i32) -> (i32, i32) {
    %c0_i32 = arith.constant 0 : i32
    %c0_i32_0 = arith.constant 0 : i32
    %c0_i32_1 = arith.constant 0 : i32
    return %c0_i32, %c0_i32_0 : i32, i32
  }
  func.func @transform_4(%arg0: i32) -> (i32, i32) {
    %c0_i32 = arith.constant 0 : i32
    %c0_i32_0 = arith.constant 0 : i32
    return %arg0, %c0_i32 : i32, i32
  }
}

</mosaic_0001>

<bundles_post_ra>
// kernel: tpu_custom_call.1
= control target key start
LH: loop header
LB: loop body
LE: loop exit
PB: predicated region body
PF: predicated region fallthrough
CT: control target
= control target key end

     0   :  { %9 = vsyncpa [#allocation3], 0  ;;  %s857_s0 = inlined_call_operand.hbm [shape: f32[128,512], index: 0, kind: input, shape index: {}]   ;;  %s858_s1 = inlined_call_operand.hbm [shape: f32[1,128], index: 1, kind: input, shape index: {}]   ;;  %s859_s2 = inlined_call_operand.vmem [shape: f32[1,128], index: 2, kind: input, shape index: {}]   ;;  %s860_s3 = inlined_call_operand.hbm [shape: f32[128,128], index: 3, kind: input, shape index: {}]   ;;  %s861_s4 = inlined_call_operand.hbm [shape: f32[128,128], index: 4, kind: output, shape index: {}]  }
   0x1   :  { %10 = vsyncpa [#allocation6], 0  ;;  %s30_s17 = sshll.u32 %s858_s1, 4  ;;  %s31_s17 = int_to_ptr.hbm [resolvable:$true] %s30_s17 }
   0x2   :  { %11 = vsyncpa [#allocation4], 0  ;;  %s668_s18 = smov [#allocation5]   ;;  %s16_s22 = sshll.u32 %s857_s0, 4  ;;  %s17_s22 = int_to_ptr.hbm [resolvable:$true] %s16_s22 }
   0x3   :  { %s32_s19 = sshll.u32 %s668_s18, 4  ;;  %s669_s23 = smov [#allocation2]   ;;  %s33_s19 = int_to_ptr.vmem [resolvable:$true] %s32_s19 }
   0x4   :  { %35 = dma.hbm_to_vmem [thread:$0]  %s31_s17, 16, %s33_s19, [#allocation6]  }
   0x5   :  { %s18_s24 = sshll.u32 %s669_s23, 4  ;;  %s670_s25 = smov 512   ;;  %s19_s24 = int_to_ptr.vmem [resolvable:$true] %s18_s24 }
   0x6   :  { %s671_s26 = smov 32   ;;  %s42_s1 = sshll.u32 %s860_s3, 4  ;;  %s43_s1 = int_to_ptr.hbm [resolvable:$true] %s42_s1 }
   0x7   :  { %24 = dma.hbm_to_vmem [thread:$0]  %s17_s22, 8192, %s19_s24, [#allocation3], %s670_s25, %s670_s25, %s671_s26  }
   0x8   :  { %s672_s29 = smov [#allocation7]   ;;  %s673_s5 = smov 128  }
   0x9   :  { %s44_s30 = sshll.u32 %s672_s29, 4  ;;  %s674_s6 = smov 8   ;;  %s45_s30 = int_to_ptr.vmem [resolvable:$true] %s44_s30 }
   0xa   :  { %50 = dma.hbm_to_vmem [thread:$0]  %s43_s1, 2048, %s45_s30, [#allocation6], %s673_s5, %s673_s5, %s674_s6  }
   0xb   :  { %662 = dma.done.wait [#allocation3], 8192  }
   0xc   :  { %663 = vsyncadd [#allocation3], 4294959104 }
   0xd   :  { %664 = dma.done.wait [#allocation6], 2064  }
   0xe   :  { %665 = vsyncadd [#allocation6], 4294965232  ;;  %v406_v0 = vld [vmem:[#allocation7 + $0x78] sm:$0xff]  ;;  %v405_v1 = vld [vmem:[#allocation7 + $0x70] sm:$0xff]  ;;  %s494_s10 = sshll.u32 %s861_s4, 4  ;;  %s495_s10 = int_to_ptr.hbm [resolvable:$true] %s494_s10 }
   0xf   :  { %509 = vmatpush.msra.mxu2 %v406_v0  ;;  %510 = vmatpush.msra.mxu3 %v406_v0  ;;  %v404_v2 = vld [vmem:[#allocation7 + $0x68] sm:$0xff]  ;;  %v403_v3 = vld [vmem:[#allocation7 + $0x60] sm:$0xff]  ;;  %v402_v4 = vld [vmem:[#allocation7 + $0x58] sm:$0xff] }
  0x10   :  { %407 = vmatpush.msra.mxu0 %v406_v0  ;;  %508 = vmatpush.msra.mxu1 %v406_v0  ;;  %v73_v5 = vld [vmem:[#allocation2 + $0x100] sm:$0xff]  ;;  %v143_v8 = vld [vmem:[#allocation2 + $0x108] sm:$0xff]  ;;  %v223_v9 = vld [vmem:[#allocation2 + $0x110] sm:$0xff] }
  0x11   :  { %512 = vmatpush.msra.mxu2 %v405_v1  ;;  %513 = vmatpush.msra.mxu3 %v405_v1  ;;  %v713_v6 = vld [vmem:[#allocation5] ss:$0 sm:$0xff]  ;;  %v303_v10 = vld [vmem:[#allocation2 + $0x118] sm:$0xff]  ;;  %v147_v16 = vld [vmem:[#allocation2 + $0x188] sm:$0xff] }
  0x12   :  { %408 = vmatpush.msra.mxu0 %v405_v1  ;;  %511 = vmatpush.msra.mxu1 %v405_v1  ;;  %v718_v7 = vld [vmem:[%s859_s2] ss:$0 sm:$0xff]  ;;  %v401_v11 = vld [vmem:[#allocation7 + $0x50] sm:$0xff]  ;;  %v92_v12 = vmul.f32 %v713_v6, %v73_v5  ;;  %v159_v13 = vmul.f32 %v713_v6, %v143_v8  ;;  %v239_v14 = vmul.f32 %v713_v6, %v223_v9  ;;  %v400_v21 = vld [vmem:[#allocation7 + $0x48] sm:$0xff]  ;;  %s675_s2 = smov [#allocation8]  }
  0x13   :  { %515 = vmatpush.msra.mxu2 %v404_v2  ;;  %516 = vmatpush.msra.mxu3 %v404_v2  ;;  %v77_v15 = vld [vmem:[#allocation2 + $0x180] sm:$0xff]  ;;  %v319_v17 = vmul.f32 %v713_v6, %v303_v10  ;;  %v163_v19 = vmul.f32 %v713_v6, %v147_v16  ;;  %v227_v20 = vld [vmem:[#allocation2 + $0x190] sm:$0xff]  ;;  %v307_v25 = vld [vmem:[#allocation2 + $0x198] sm:$0xff]  ;;  %s492_s7 = sshll.u32 %s675_s2, 4  ;;  %s493_s7 = int_to_ptr.vmem [resolvable:$true] %s492_s7 }
  0x14   :  { %409 = vmatpush.msra.mxu0 %v404_v2  ;;  %514 = vmatpush.msra.mxu1 %v404_v2  ;;  %v96_v18 = vmul.f32 %v713_v6, %v77_v15  ;;  %v111_v22 = vadd.f32 %v718_v7, %v92_v12  ;;  %v175_v23 = vadd.f32 %v718_v7, %v159_v13  ;;  %v65_v29 = vld [vmem:[#allocation2] sm:$0xff]  ;;  %v135_v35 = vld [vmem:[#allocation2 + $0x8] sm:$0xff]  ;;  %v215_v39 = vld [vmem:[#allocation2 + $0x10] sm:$0xff] }
  0x15   :  { %518 = vmatpush.msra.mxu2 %v403_v3  ;;  %519 = vmatpush.msra.mxu3 %v403_v3  ;;  %v255_v24 = vadd.f32 %v718_v7, %v239_v14  ;;  %v730_v26 = vadd.f32 %v718_v7, %v319_v17  ;;  %v179_v28 = vadd.f32 %v718_v7, %v163_v19  ;;  %v399_v30 = vld [vmem:[#allocation7 + $0x40] sm:$0xff]  ;;  %v398_v40 = vld [vmem:[#allocation7 + $0x38] sm:$0xff]  ;;  %v397_v50 = vld [vmem:[#allocation7 + $0x30] sm:$0xff] }
  0x16   :  { %410 = vmatpush.msra.mxu0 %v403_v3  ;;  %517 = vmatpush.msra.mxu1 %v403_v3  ;;  %v115_v27 = vadd.f32 %v718_v7, %v96_v18  ;;  %v127_v31 = vmax.f32 %v111_v22, 0.0  ;;  %v191_v32 = vmax.f32 %v175_v23, 0.0  ;;  %v243_v34 = vmul.f32 %v713_v6, %v227_v20  ;;  %v295_v44 = vld [vmem:[#allocation2 + $0x18] sm:$0xff]  ;;  %v69_v45 = vld [vmem:[#allocation2 + $0x80] sm:$0xff]  ;;  %v139_v55 = vld [vmem:[#allocation2 + $0x88] sm:$0xff] }
  0x17   :  { %521 = vmatpush.msra.mxu2 %v402_v4  ;;  %522 = vmatpush.msra.mxu3 %v402_v4  ;;  %v271_v33 = vmax.f32 %v255_v24, 0.0  ;;  %v195_v37 = vmax.f32 %v179_v28, 0.0  ;;  %v323_v38 = vmul.f32 %v713_v6, %v307_v25  ;;  %v84_v43 = vmul.f32 %v713_v6, %v65_v29  ;;  %v219_v60 = vld [vmem:[#allocation2 + $0x90] sm:$0xff]  ;;  %v299_v5 = vld [vmem:[#allocation2 + $0x98] sm:$0xff]  ;;  %v74_v8 = vld [vmem:[#allocation2 + $0x120] sm:$0xff] }
  0x18   :  { %411 = vmatpush.msra.mxu0 %v402_v4  ;;  %520 = vmatpush.msra.mxu1 %v402_v4  ;;  %v131_v36 = vmax.f32 %v115_v27, 0.0  ;;  %v207_v41 = vadd.f32 %v191_v32, %v127_v31  ;;  %v259_v42 = vadd.f32 %v718_v7, %v243_v34  ;;  %v351_v46 = vmax.f32 %v730_v26, 0.0  ;;  %v396_v61 = vld [vmem:[#allocation7 + $0x28] sm:$0xff]  ;;  %v395_v9 = vld [vmem:[#allocation7 + $0x20] sm:$0xff]  ;;  %v304_v20 = vld [vmem:[#allocation2 + $0x138] sm:$0xff] }
  0x19   :  { %524 = vmatpush.msra.mxu2 %v401_v11  ;;  %525 = vmatpush.msra.mxu3 %v401_v11  ;;  %v339_v48 = vadd.f32 %v718_v7, %v323_v38  ;;  %v151_v49 = vmul.f32 %v713_v6, %v135_v35  ;;  %v103_v53 = vadd.f32 %v718_v7, %v84_v43  ;;  %v144_v14 = vld [vmem:[#allocation2 + $0x128] sm:$0xff]  ;;  %v224_v15 = vld [vmem:[#allocation2 + $0x130] sm:$0xff]  ;;  %v78_v34 = vld [vmem:[#allocation2 + $0x1a0] sm:$0xff] }
  0x1a   :  { %412 = vmatpush.msra.mxu0 %v401_v11  ;;  %523 = vmatpush.msra.mxu1 %v401_v11  ;;  %v211_v47 = vadd.f32 %v195_v37, %v131_v36  ;;  %v287_v51 = vadd.f32 %v271_v33, %v207_v41  ;;  %v275_v52 = vmax.f32 %v259_v42, 0.0  ;;  %v231_v54 = vmul.f32 %v713_v6, %v215_v39  ;;  %v393_v29 = vld [vmem:[#allocation7 + $0x10] sm:$0xff]  ;;  %v148_v38 = vld [vmem:[#allocation2 + $0x1a8] sm:$0xff] }
  0x1b   :  { %527 = vmatpush.msra.mxu2 %v400_v21  ;;  %528 = vmatpush.msra.mxu3 %v400_v21  ;;  %v355_v56 = vmax.f32 %v339_v48, 0.0  ;;  %v167_v57 = vadd.f32 %v718_v7, %v151_v49  ;;  %v311_v58 = vmul.f32 %v713_v6, %v295_v44  ;;  %v88_v59 = vmul.f32 %v713_v6, %v69_v45  ;;  %v228_v39 = vld [vmem:[#allocation2 + $0x1b0] sm:$0xff]  ;;  %v308_v49 = vld [vmem:[#allocation2 + $0x1b8] sm:$0xff] }
  0x1c   :  { %413 = vmatpush.msra.mxu0 %v400_v21  ;;  %526 = vmatpush.msra.mxu1 %v400_v21  ;;  %v291_v62 = vadd.f32 %v275_v52, %v211_v47  ;;  %v119_v63 = vmax.f32 %v103_v53, 0.0  ;;  %v247_v0 = vadd.f32 %v718_v7, %v231_v54  ;;  %v155_v4 = vmul.f32 %v713_v6, %v139_v55  ;;  %v394_v21 = vld [vmem:[#allocation7 + $0x18] sm:$0xff] }
  0x1d   :  { %530 = vmatpush.msra.mxu2 %v399_v30  ;;  %531 = vmatpush.msra.mxu3 %v399_v30  ;;  %v183_v1 = vmax.f32 %v167_v57, 0.0  ;;  %v327_v2 = vadd.f32 %v718_v7, %v311_v58  ;;  %v107_v3 = vadd.f32 %v718_v7, %v88_v59  ;;  %v367_v10 = vadd.f32 %v351_v46, %v287_v51  ;;  %v66_v55 = vld [vmem:[#allocation2 + $0x20] sm:$0xff] }
  0x1e   :  { %414 = vmatpush.msra.mxu0 %v399_v30  ;;  %529 = vmatpush.msra.mxu1 %v399_v30  ;;  %v371_v11 = vadd.f32 %v355_v56, %v291_v62  ;;  %v263_v12 = vmax.f32 %v247_v0, 0.0  ;;  %v235_v13 = vmul.f32 %v713_v6, %v219_v60  ;;  %v171_v19 = vadd.f32 %v718_v7, %v155_v4  ;;  %v136_v60 = vld [vmem:[#allocation2 + $0x28] sm:$0xff] }
  0x1f   :  { %533 = vmatpush.msra.mxu2 %v398_v40  ;;  %534 = vmatpush.msra.mxu3 %v398_v40  ;;  %v199_v16 = vadd.f32 %v183_v1, %v119_v63  ;;  %v343_v17 = vmax.f32 %v327_v2, 0.0  ;;  %v123_v18 = vmax.f32 %v107_v3, 0.0  ;;  %v315_v23 = vmul.f32 %v713_v6, %v299_v5  ;;  %v216_v1 = vld [vmem:[#allocation2 + $0x30] sm:$0xff] }
  0x20   :  { %415 = vmatpush.msra.mxu0 %v398_v40  ;;  %532 = vmatpush.msra.mxu1 %v398_v40  ;;  %v251_v22 = vadd.f32 %v718_v7, %v235_v13  ;;  %v93_v24 = vmul.f32 %v713_v6, %v74_v8  ;;  %v187_v26 = vmax.f32 %v171_v19, 0.0  ;;  %v160_v27 = vmul.f32 %v713_v6, %v144_v14  ;;  %v392_v40 = vld [vmem:[#allocation7 + $0x8] sm:$0xff]  ;;  %v296_v8 = vld [vmem:[#allocation2 + $0x38] sm:$0xff]  ;;  %v70_v13 = vld [vmem:[#allocation2 + $0xa0] sm:$0xff] }
  0x21   :  { %536 = vmatpush.msra.mxu2 %v397_v50  ;;  %537 = vmatpush.msra.mxu3 %v397_v50  ;;  %v279_v25 = vadd.f32 %v263_v12, %v199_v16  ;;  %v240_v28 = vmul.f32 %v713_v6, %v224_v15  ;;  %v331_v31 = vadd.f32 %v718_v7, %v315_v23  ;;  %v383_v45 = vmul.f32 0.25, %v367_v10  ;;  %v300_v23 = vld [vmem:[#allocation2 + $0xb8] sm:$0xff] }
  0x22   :  { %416 = vmatpush.msra.mxu0 %v397_v50  ;;  %535 = vmatpush.msra.mxu1 %v397_v50  ;;  %v267_v30 = vmax.f32 %v251_v22, 0.0  ;;  %v112_v32 = vadd.f32 %v718_v7, %v93_v24  ;;  %v320_v33 = vmul.f32 %v713_v6, %v304_v20  ;;  %v203_v36 = vadd.f32 %v187_v26, %v123_v18  ;;  %v391_v50 = vld [vmem:[#allocation7] sm:$0xff]  ;;  %v220_v22 = vld [vmem:[#allocation2 + $0xb0] sm:$0xff] }
  0x23   :  { %539 = vmatpush.msra.mxu2 %v396_v61  ;;  %540 = vmatpush.msra.mxu3 %v396_v61  ;;  %v359_v35 = vadd.f32 %v343_v17, %v279_v25  ;;  %v176_v37 = vadd.f32 %v718_v7, %v160_v27  ;;  %v347_v41 = vmax.f32 %v331_v31, 0.0  ;;  %v256_v43 = vadd.f32 %v718_v7, %v240_v28  ;;  %v140_v17 = vld [vmem:[#allocation2 + $0xa8] sm:$0xff] }
  0x24   :  { %417 = vmatpush.msra.mxu0 %v396_v61  ;;  %538 = vmatpush.msra.mxu1 %v396_v61  ;;  %v128_v42 = vmax.f32 %v112_v32, 0.0  ;;  %v336_v44 = vadd.f32 %v718_v7, %v320_v33  ;;  %v283_v46 = vadd.f32 %v267_v30, %v203_v36  ;;  %v97_v48 = vmul.f32 %v713_v6, %v78_v34  ;;  %v75_v32 = vld [vmem:[#allocation2 + $0x140] sm:$0xff] }
  0x25   :  { %542 = vmatpush.msra.mxu2 %v395_v9  ;;  %543 = vmatpush.msra.mxu3 %v395_v9  ;;  %v192_v47 = vmax.f32 %v176_v37, 0.0  ;;  %v387_v51 = vmul.f32 0.25, %v371_v11  ;;  %v272_v52 = vmax.f32 %v256_v43, 0.0  ;;  %v164_v53 = vmul.f32 %v713_v6, %v148_v38  ;;  %v145_v37 = vld [vmem:[#allocation2 + $0x148] sm:$0xff] }
  0x26   :  { %418 = vmatpush.msra.mxu0 %v395_v9  ;;  %541 = vmatpush.msra.mxu1 %v395_v9  ;;  %v244_v54 = vmul.f32 %v713_v6, %v228_v39  ;;  %v363_v56 = vadd.f32 %v347_v41, %v283_v46  ;;  %v352_v58 = vmax.f32 %v336_v44, 0.0  ;;  %v116_v59 = vadd.f32 %v718_v7, %v97_v48 }
  0x27   :  { %545 = vmatpush.msra.mxu2 %v394_v21  ;;  %546 = vmatpush.msra.mxu3 %v394_v21  ;;  %v208_v57 = vadd.f32 %v192_v47, %v128_v42  ;;  %v375_v61 = vmul.f32 0.25, %v359_v35  ;;  %v180_v62 = vadd.f32 %v718_v7, %v164_v53  ;;  %v324_v0 = vmul.f32 %v713_v6, %v308_v49  ;;  %v225_v42 = vld [vmem:[#allocation2 + $0x150] sm:$0xff]  ;;  %v305_v47 = vld [vmem:[#allocation2 + $0x158] sm:$0xff]  ;;  %v149_v53 = vld [vmem:[#allocation2 + $0x1c8] sm:$0xff] }
  0x28   :  { %419 = vmatpush.msra.mxu0 %v394_v21  ;;  %544 = vmatpush.msra.mxu1 %v394_v21  ;;  %v260_v63 = vadd.f32 %v718_v7, %v244_v54  ;;  %v379_v2 = vmul.f32 0.25, %v363_v56  ;;  %v132_v4 = vmax.f32 %v116_v59, 0.0  ;;  %v85_v5 = vmul.f32 %v713_v6, %v66_v55 }
  0x29   :  { %548 = vmatpush.msra.mxu2 %v393_v29  ;;  %549 = vmatpush.msra.mxu3 %v393_v29  ;;  %v288_v3 = vadd.f32 %v272_v52, %v208_v57  ;;  %v196_v9 = vmax.f32 %v180_v62, 0.0  ;;  %v340_v11 = vadd.f32 %v718_v7, %v324_v0  ;;  %v152_v12 = vmul.f32 %v713_v6, %v136_v60  ;;  %v79_v52 = vld [vmem:[#allocation2 + $0x1c0] sm:$0xff]  ;;  %v229_v62 = vld [vmem:[#allocation2 + $0x1d0] sm:$0xff] }
  0x2a   :  { %420 = vmatpush.msra.mxu0 %v393_v29  ;;  %547 = vmatpush.msra.mxu1 %v393_v29  ;;  %v276_v10 = vmax.f32 %v260_v63, 0.0  ;;  %v104_v15 = vadd.f32 %v718_v7, %v85_v5  ;;  %v232_v16 = vmul.f32 %v713_v6, %v216_v1  ;;  %v312_v21 = vmul.f32 %v713_v6, %v296_v8 }
  0x2b   :  { %551 = vmatpush.msra.mxu2 %v392_v40  ;;  %552 = vmatpush.msra.mxu3 %v392_v40  ;;  %v368_v14 = vadd.f32 %v352_v58, %v288_v3  ;;  %v212_v18 = vadd.f32 %v196_v9, %v132_v4  ;;  %v356_v19 = vmax.f32 %v340_v11, 0.0  ;;  %v168_v20 = vadd.f32 %v718_v7, %v152_v12  ;;  %v309_v3 = vld [vmem:[#allocation2 + $0x1d8] sm:$0xff] }
  0x2c   :  { %421 = vmatpush.msra.mxu0 %v392_v40  ;;  %550 = vmatpush.msra.mxu1 %v392_v40  ;;  %v120_v25 = vmax.f32 %v104_v15, 0.0  ;;  %v248_v26 = vadd.f32 %v718_v7, %v232_v16  ;;  %v89_v27 = vmul.f32 %v713_v6, %v70_v13  ;;  %v328_v30 = vadd.f32 %v718_v7, %v312_v21  ;;  %v137_v15 = vld [vmem:[#allocation2 + $0x48] sm:$0xff] }
  0x2d   :  { %554 = vmatpush.msra.mxu2 %v391_v50  ;;  %555 = vmatpush.msra.mxu3 %v391_v50  ;;  %v384_v24 = vmul.f32 0.25, %v368_v14  ;;  %v292_v28 = vadd.f32 %v276_v10, %v212_v18  ;;  %v184_v29 = vmax.f32 %v168_v20, 0.0  ;;  %v156_v31 = vmul.f32 %v713_v6, %v140_v17  ;;  %v67_v10 = vld [vmem:[#allocation2 + $0x40] sm:$0xff]  ;;  %v217_v20 = vld [vmem:[#allocation2 + $0x50] sm:$0xff] }
  0x2e   :  { %447 = vmatmul.f32.vlgmr.msra.gmra.mxu2 %v383_v45  ;;  %459 = vmatmul.f32.vlgmr.msra.gmra.mxu3 %v387_v51  ;;  %v264_v33 = vmax.f32 %v248_v26, 0.0  ;;  %v108_v34 = vadd.f32 %v718_v7, %v89_v27  ;;  %v236_v35 = vmul.f32 %v713_v6, %v220_v22  ;;  %v316_v36 = vmul.f32 %v713_v6, %v300_v23 }
  0x2f   :  { %422 = vmatpush.msra.mxu0 %v391_v50  ;;  %553 = vmatpush.msra.mxu1 %v391_v50  ;;  %v372_v38 = vadd.f32 %v356_v19, %v292_v28  ;;  %v200_v39 = vadd.f32 %v184_v29, %v120_v25  ;;  %v344_v40 = vmax.f32 %v328_v30, 0.0  ;;  %v172_v41 = vadd.f32 %v718_v7, %v156_v31  ;;  %v297_v25 = vld [vmem:[#allocation2 + $0x58] sm:$0xff]  ;;  %v71_v30 = vld [vmem:[#allocation2 + $0xc0] sm:$0xff] }
  0x30   :  { %423 = vmatmul.f32.vlgmr.msra.gmra.mxu0 %v375_v61  ;;  %435 = vmatmul.f32.vlgmr.msra.gmra.mxu1 %v379_v2  ;;  %v124_v43 = vmax.f32 %v108_v34, 0.0  ;;  %v252_v44 = vadd.f32 %v718_v7, %v236_v35  ;;  %v332_v45 = vadd.f32 %v718_v7, %v316_v36  ;;  %v94_v46 = vmul.f32 %v713_v6, %v75_v32  ;;  %v141_v35 = vld [vmem:[#allocation2 + $0xc8] sm:$0xff] }
  0x31   :  { %v388_v48 = vmul.f32 0.25, %v372_v38  ;;  %v280_v49 = vadd.f32 %v264_v33, %v200_v39  ;;  %v188_v50 = vmax.f32 %v172_v41, 0.0  ;;  %v161_v51 = vmul.f32 %v713_v6, %v145_v37 }
  0x32   :  { %v268_v54 = vmax.f32 %v252_v44, 0.0  ;;  %v348_v55 = vmax.f32 %v332_v45, 0.0  ;;  %v113_v56 = vadd.f32 %v718_v7, %v94_v46  ;;  %v241_v57 = vmul.f32 %v713_v6, %v225_v42  ;;  %v301_v45 = vld [vmem:[#allocation2 + $0xd8] sm:$0xff] }
  0x33   :  { %v360_v58 = vadd.f32 %v344_v40, %v280_v49  ;;  %v204_v59 = vadd.f32 %v188_v50, %v124_v43  ;;  %v177_v60 = vadd.f32 %v718_v7, %v161_v51  ;;  %v321_v61 = vmul.f32 %v713_v6, %v305_v47  ;;  %v221_v40 = vld [vmem:[#allocation2 + $0xd0] sm:$0xff]  ;;  %v76_v50 = vld [vmem:[#allocation2 + $0x160] sm:$0xff] }
  0x34   :  { %v129_v63 = vmax.f32 %v113_v56, 0.0  ;;  %v257_v0 = vadd.f32 %v718_v7, %v241_v57  ;;  %v98_v1 = vmul.f32 %v713_v6, %v79_v52  ;;  %v165_v2 = vmul.f32 %v713_v6, %v149_v53 }
  0x35   :  { %v376_v4 = vmul.f32 0.25, %v360_v58  ;;  %v284_v5 = vadd.f32 %v268_v54, %v204_v59  ;;  %v193_v8 = vmax.f32 %v177_v60, 0.0  ;;  %v337_v9 = vadd.f32 %v718_v7, %v321_v61  ;;  %v226_v60 = vld [vmem:[#allocation2 + $0x170] sm:$0xff]  ;;  %v306_v61 = vld [vmem:[#allocation2 + $0x178] sm:$0xff] }
  0x36   :  { %450 = vmatmul.f32.gmra.mxu2 %v384_v24  ;;  %462 = vmatmul.f32.gmra.mxu3 %v388_v48  ;;  %v273_v11 = vmax.f32 %v257_v0, 0.0  ;;  %v117_v12 = vadd.f32 %v718_v7, %v98_v1  ;;  %v181_v13 = vadd.f32 %v718_v7, %v165_v2  ;;  %v245_v14 = vmul.f32 %v713_v6, %v229_v62 }
  0x37   :  { %v364_v16 = vadd.f32 %v348_v55, %v284_v5  ;;  %v209_v17 = vadd.f32 %v193_v8, %v129_v63  ;;  %v353_v18 = vmax.f32 %v337_v9, 0.0  ;;  %v325_v19 = vmul.f32 %v713_v6, %v309_v3  ;;  %v146_v55 = vld [vmem:[#allocation2 + $0x168] sm:$0xff]  ;;  %v80_v8 = vld [vmem:[#allocation2 + $0x1e0] sm:$0xff] }
  0x38   :  { %426 = vmatmul.f32.gmra.mxu0 %v376_v4  ;;  %v133_v21 = vmax.f32 %v117_v12, 0.0  ;;  %v197_v22 = vmax.f32 %v181_v13, 0.0  ;;  %v261_v23 = vadd.f32 %v718_v7, %v245_v14  ;;  %v86_v24 = vmul.f32 %v713_v6, %v67_v10  ;;  %v150_v13 = vld [vmem:[#allocation2 + $0x1e8] sm:$0xff] }
  0x39   :  { %v380_v26 = vmul.f32 0.25, %v364_v16  ;;  %v289_v27 = vadd.f32 %v273_v11, %v209_v17  ;;  %v341_v28 = vadd.f32 %v718_v7, %v325_v19  ;;  %v153_v29 = vmul.f32 %v713_v6, %v137_v15 }
  0x3a   :  { %v213_v31 = vadd.f32 %v197_v22, %v133_v21  ;;  %v277_v32 = vmax.f32 %v261_v23, 0.0  ;;  %v105_v33 = vadd.f32 %v718_v7, %v86_v24  ;;  %v233_v34 = vmul.f32 %v713_v6, %v217_v20  ;;  %v310_v23 = vld [vmem:[#allocation2 + $0x1f8] sm:$0xff] }
  0x3b   :  { %438 = vmatmul.f32.gmra.mxu1 %v380_v26  ;;  %v369_v36 = vadd.f32 %v353_v18, %v289_v27  ;;  %v357_v37 = vmax.f32 %v341_v28, 0.0  ;;  %v169_v38 = vadd.f32 %v718_v7, %v153_v29  ;;  %v313_v39 = vmul.f32 %v713_v6, %v297_v25  ;;  %v230_v18 = vld [vmem:[#allocation2 + $0x1f0] sm:$0xff]  ;;  %v68_v28 = vld [vmem:[#allocation2 + $0x60] sm:$0xff]  ;;  %v138_v29 = vld [vmem:[#allocation2 + $0x68] sm:$0xff] }
  0x3c   :  { %v293_v41 = vadd.f32 %v277_v32, %v213_v31  ;;  %v121_v42 = vmax.f32 %v105_v33, 0.0  ;;  %v249_v43 = vadd.f32 %v718_v7, %v233_v34  ;;  %v90_v44 = vmul.f32 %v713_v6, %v71_v30 }
  0x3d   :  { %v385_v46 = vmul.f32 0.25, %v369_v36  ;;  %v185_v47 = vmax.f32 %v169_v38, 0.0  ;;  %v329_v48 = vadd.f32 %v718_v7, %v313_v39  ;;  %v157_v49 = vmul.f32 %v713_v6, %v141_v35  ;;  %v218_v38 = vld [vmem:[#allocation2 + $0x70] sm:$0xff] }
  0x3e   :  { %v373_v51 = vadd.f32 %v357_v37, %v293_v41  ;;  %v265_v52 = vmax.f32 %v249_v43, 0.0  ;;  %v109_v53 = vadd.f32 %v718_v7, %v90_v44  ;;  %v237_v54 = vmul.f32 %v713_v6, %v221_v40  ;;  %v298_v43 = vld [vmem:[#allocation2 + $0x78] sm:$0xff] }
  0x3f   :  { %453 = vmatmul.f32.gmra.mxu2 %v385_v46  ;;  %v201_v56 = vadd.f32 %v185_v47, %v121_v42  ;;  %v345_v57 = vmax.f32 %v329_v48, 0.0  ;;  %v173_v58 = vadd.f32 %v718_v7, %v157_v49  ;;  %v317_v59 = vmul.f32 %v713_v6, %v301_v45  ;;  %v72_v48 = vld [vmem:[#allocation2 + $0xe0] sm:$0xff] }
  0x40   :  { %v389_v62 = vmul.f32 0.25, %v373_v51  ;;  %v125_v63 = vmax.f32 %v109_v53, 0.0  ;;  %v253_v0 = vadd.f32 %v718_v7, %v237_v54  ;;  %v95_v1 = vmul.f32 %v713_v6, %v76_v50  ;;  %v142_v53 = vld [vmem:[#allocation2 + $0xe8] sm:$0xff] }
  0x41   :  { %v281_v2 = vadd.f32 %v265_v52, %v201_v56  ;;  %v189_v3 = vmax.f32 %v173_v58, 0.0  ;;  %v333_v4 = vadd.f32 %v718_v7, %v317_v59  ;;  %v162_v5 = vmul.f32 %v713_v6, %v146_v55  ;;  %v222_v58 = vld [vmem:[#allocation2 + $0xf0] sm:$0xff] }
  0x42   :  { %465 = vmatmul.f32.gmra.mxu3 %v389_v62  ;;  %v269_v9 = vmax.f32 %v253_v0, 0.0  ;;  %v114_v10 = vadd.f32 %v718_v7, %v95_v1  ;;  %v242_v11 = vmul.f32 %v713_v6, %v226_v60  ;;  %v322_v12 = vmul.f32 %v713_v6, %v306_v61 }
  0x43   :  { %v361_v14 = vadd.f32 %v345_v57, %v281_v2  ;;  %v205_v15 = vadd.f32 %v189_v3, %v125_v63  ;;  %v349_v16 = vmax.f32 %v333_v4, 0.0  ;;  %v178_v17 = vadd.f32 %v718_v7, %v162_v5  ;;  %v302_v63 = vld [vmem:[#allocation2 + $0xf8] sm:$0xff] }
  0x44   :  { %v130_v19 = vmax.f32 %v114_v10, 0.0  ;;  %v258_v20 = vadd.f32 %v718_v7, %v242_v11  ;;  %v338_v21 = vadd.f32 %v718_v7, %v322_v12  ;;  %v99_v22 = vmul.f32 %v713_v6, %v80_v8 }
  0x45   :  { %v377_v24 = vmul.f32 0.25, %v361_v14  ;;  %v285_v25 = vadd.f32 %v269_v9, %v205_v15  ;;  %v194_v26 = vmax.f32 %v178_v17, 0.0  ;;  %v166_v27 = vmul.f32 %v713_v6, %v150_v13 }
  0x46   :  { %v274_v30 = vmax.f32 %v258_v20, 0.0  ;;  %v354_v31 = vmax.f32 %v338_v21, 0.0  ;;  %v118_v32 = vadd.f32 %v718_v7, %v99_v22  ;;  %v246_v33 = vmul.f32 %v713_v6, %v230_v18 }
  0x47   :  { %429 = vmatmul.f32.gmra.mxu0 %v377_v24  ;;  %v365_v34 = vadd.f32 %v349_v16, %v285_v25  ;;  %v210_v35 = vadd.f32 %v194_v26, %v130_v19  ;;  %v182_v36 = vadd.f32 %v718_v7, %v166_v27  ;;  %v326_v37 = vmul.f32 %v713_v6, %v310_v23 }
  0x48   :  { %v134_v39 = vmax.f32 %v118_v32, 0.0  ;;  %v262_v40 = vadd.f32 %v718_v7, %v246_v33  ;;  %v87_v41 = vmul.f32 %v713_v6, %v68_v28  ;;  %v154_v42 = vmul.f32 %v713_v6, %v138_v29 }
  0x49   :  { %v381_v44 = vmul.f32 0.25, %v365_v34  ;;  %v290_v45 = vadd.f32 %v274_v30, %v210_v35  ;;  %v198_v46 = vmax.f32 %v182_v36, 0.0  ;;  %v342_v47 = vadd.f32 %v718_v7, %v326_v37 }
  0x4a   :  { %v278_v49 = vmax.f32 %v262_v40, 0.0  ;;  %v106_v50 = vadd.f32 %v718_v7, %v87_v41  ;;  %v170_v51 = vadd.f32 %v718_v7, %v154_v42  ;;  %v234_v52 = vmul.f32 %v713_v6, %v218_v38 }
  0x4b   :  { %441 = vmatmul.f32.gmra.mxu1 %v381_v44  ;;  %v370_v54 = vadd.f32 %v354_v31, %v290_v45  ;;  %v214_v55 = vadd.f32 %v198_v46, %v134_v39  ;;  %v358_v56 = vmax.f32 %v342_v47, 0.0  ;;  %v314_v57 = vmul.f32 %v713_v6, %v298_v43 }
  0x4c   :  { %v122_v59 = vmax.f32 %v106_v50, 0.0  ;;  %v186_v60 = vmax.f32 %v170_v51, 0.0  ;;  %v250_v61 = vadd.f32 %v718_v7, %v234_v52  ;;  %v91_v62 = vmul.f32 %v713_v6, %v72_v48 }
  0x4d   :  { %v386_v0 = vmul.f32 0.25, %v370_v54  ;;  %v294_v1 = vadd.f32 %v278_v49, %v214_v55  ;;  %v330_v2 = vadd.f32 %v718_v7, %v314_v57  ;;  %v158_v3 = vmul.f32 %v713_v6, %v142_v53 }
  0x4e   :  { %v202_v4 = vadd.f32 %v186_v60, %v122_v59  ;;  %v266_v5 = vmax.f32 %v250_v61, 0.0  ;;  %v110_v8 = vadd.f32 %v718_v7, %v91_v62  ;;  %v238_v9 = vmul.f32 %v713_v6, %v222_v58 }
  0x4f   :  { %456 = vmatmul.f32.gmra.mxu2 %v386_v0  ;;  %v374_v10 = vadd.f32 %v358_v56, %v294_v1  ;;  %v346_v11 = vmax.f32 %v330_v2, 0.0  ;;  %v174_v12 = vadd.f32 %v718_v7, %v158_v3  ;;  %v318_v13 = vmul.f32 %v713_v6, %v302_v63 }
  0x50   :  { %v282_v14 = vadd.f32 %v266_v5, %v202_v4  ;;  %v126_v15 = vmax.f32 %v110_v8, 0.0  ;;  %v254_v16 = vadd.f32 %v718_v7, %v238_v9 }
  0x51   :  { %v390_v17 = vmul.f32 0.25, %v374_v10  ;;  %v190_v18 = vmax.f32 %v174_v12, 0.0  ;;  %v334_v19 = vadd.f32 %v718_v7, %v318_v13 }
  0x52   :  { %v362_v20 = vadd.f32 %v346_v11, %v282_v14  ;;  %v270_v21 = vmax.f32 %v254_v16, 0.0 }
  0x53   :  { %468 = vmatmul.f32.gmra.mxu3 %v390_v17  ;;  %v206_v22 = vadd.f32 %v190_v18, %v126_v15  ;;  %v350_v23 = vmax.f32 %v334_v19, 0.0 }
  0x54   :  { %v378_v24 = vmul.f32 0.25, %v362_v20 }
  0x55   :  { %v286_v25 = vadd.f32 %v270_v21, %v206_v22 }
  0x56   :  { %432 = vmatmul.f32.gmra.mxu0 %v378_v24 }
  0x57   :  { %v366_v26 = vadd.f32 %v350_v23, %v286_v25 }
  0x59   :  { %v382_v27 = vmul.f32 0.25, %v366_v26 }
  0x5b   :  { %444 = vmatmul.f32.gmra.mxu1 %v382_v27 }
  0xad   :  { %v424_v6 = vpop.f32.mrf.mxu0  ;;  %v436_v28 = vpop.f32.mrf.mxu1 }
  0xae   :  { %472 = vst [vmem:[#allocation8] sm:$0xff] %v424_v6 }
  0xaf   :  { %476 = vst [vmem:[#allocation8 + $0x20] sm:$0xff] %v436_v28 }
  0xb1   :  { %v448_v29 = vpop.f32.mrf.mxu2  ;;  %v460_v30 = vpop.f32.mrf.mxu3 }
  0xb2   :  { %480 = vst [vmem:[#allocation8 + $0x40] sm:$0xff] %v448_v29 }
  0xb3   :  { %484 = vst [vmem:[#allocation8 + $0x60] sm:$0xff] %v460_v30 }
  0xb5   :  { %v427_v7 = vpop.f32.mrf.mxu0 }
  0xb6   :  { %473 = vst [vmem:[#allocation8 + $0x8] sm:$0xff] %v427_v7 }
  0xb8   :  { %v439_v33 = vpop.f32.mrf.mxu1 }
  0xb9   :  { %v451_v31 = vpop.f32.mrf.mxu2  ;;  %v463_v32 = vpop.f32.mrf.mxu3  ;;  %477 = vst [vmem:[#allocation8 + $0x28] sm:$0xff] %v439_v33 }
  0xba   :  { %481 = vst [vmem:[#allocation8 + $0x48] sm:$0xff] %v451_v31 }
  0xbb   :  { %485 = vst [vmem:[#allocation8 + $0x68] sm:$0xff] %v463_v32 }
  0xc2   :  { %v454_v34 = vpop.f32.mrf.mxu2 }
  0xc3   :  { %482 = vst [vmem:[#allocation8 + $0x50] sm:$0xff] %v454_v34 }
  0xc4   :  { %v430_v35 = vpop.f32.mrf.mxu0 }
  0xc5   :  { %474 = vst [vmem:[#allocation8 + $0x10] sm:$0xff] %v430_v35  ;;  %v466_v36 = vpop.f32.mrf.mxu3 }
  0xc6   :  { %486 = vst [vmem:[#allocation8 + $0x70] sm:$0xff] %v466_v36 }
  0xc8   :  { %v442_v37 = vpop.f32.mrf.mxu1 }
  0xc9   :  { %478 = vst [vmem:[#allocation8 + $0x30] sm:$0xff] %v442_v37 }
  0xd2   :  { %v457_v38 = vpop.f32.mrf.mxu2 }
  0xd3   :  { %v433_v39 = vpop.f32.mrf.mxu0  ;;  %483 = vst [vmem:[#allocation8 + $0x58] sm:$0xff] %v457_v38 }
  0xd4   :  { %475 = vst [vmem:[#allocation8 + $0x18] sm:$0xff] %v433_v39 }
  0xd6   :  { %v469_v40 = vpop.f32.mrf.mxu3 }
  0xd7   :  { %487 = vst [vmem:[#allocation8 + $0x78] sm:$0xff] %v469_v40 }
  0xd8   :  { %v445_v41 = vpop.f32.mrf.mxu1 }
  0xd9   :  { %479 = vst [vmem:[#allocation8 + $0x38] sm:$0xff] %v445_v41 }
  0xda   :  { %500 = dma.vmem_to_hbm [thread:$0]  %s493_s7, 2048, %s495_s10, [#allocation4], %s673_s5, %s673_s5, %s674_s6  }
  0xdb   :  { %666 = dma.done.wait [#allocation4], 2048  }
  0xdc   :  { %667 = vsyncadd [#allocation4], 4294965248 }
  0xdd   :  { %505 = vsyncpa [#allocation3], 1 }
  0xde   :  { %506 = vsyncpa [#allocation6], 1 }
  0xdf   :  { %507 = vsyncpa [#allocation4], 1 }

</bundles_post_ra>
